<compile_context>
chip_gen: v5e
topology: v5e:2x2
jax: 0.10.0
libtpu: 0.0.40
codegen_flags: <defaults>
</compile_context>

<pallas_src>
import functools

import jax
import jax.numpy as jnp
from jax.experimental import pallas as pl
from jax.experimental.pallas import tpu as pltpu


def _round_up(x, m):
    return ((x + m - 1) // m) * m


def _largest_aligned_divisor(total, align, cap):
    """Largest d <= cap with d % align == 0 and total % d == 0.

    `total` is always a multiple of `align` by construction, so the fallback
    `align` is a valid divisor.
    """
    cap = max(align, min(cap, total))
    cap = (cap // align) * align
    for d in range(cap, align - 1, -align):
        if total % d == 0:
            return d
    return align


def _gen_config():
    """Per-generation tile caps and VMEM limit."""
    kind = ""
    try:
        kind = jax.devices()[0].device_kind.lower()
    except Exception:
        pass
    if "v5 lite" in kind or "v5e" in kind or "v5litepod" in kind:
        # v5e: 128 MiB VMEM, most HBM-bound -> big M tiles, bf16 mandatory-ish.
        return dict(max_tm=512, max_tn=512, max_tk=4096,
                    vmem_cap=96 * 1024 * 1024, two_core=False)
    if "v7" in kind:
        # v7x: 64 MiB VMEM per TC, 2 TCs -> keep >=2 parallel blocks, cap 48 MiB.
        return dict(max_tm=512, max_tn=512, max_tk=2048,
                    vmem_cap=48 * 1024 * 1024, two_core=True)
    if "v6" in kind:
        # v6e: 128 MiB VMEM, 2x256^2 MXU.
        return dict(max_tm=512, max_tn=512, max_tk=4096,
                    vmem_cap=100 * 1024 * 1024, two_core=False)
    if "v5p" in kind or kind.strip().endswith("v5"):
        # v5p: large VMEM, treat like v6e-ish.
        return dict(max_tm=512, max_tn=512, max_tk=4096,
                    vmem_cap=96 * 1024 * 1024, two_core=False)
    # v4 / unknown: conservative VMEM cap, safe everywhere.
    return dict(max_tm=512, max_tn=512, max_tk=2048,
                vmem_cap=48 * 1024 * 1024, two_core=False)


# ----------------------------- kernels ---------------------------------------


def _fullk_kernel(x_ref, w_ref, b_ref, o_ref):
    # x:(tm,Kp)  w:(Kp,tn)  b:(1,tn)  o:(tm,tn)
    # Single MXU contraction + bias epilogue; no scratch, no k axis.
    o_ref[...] = (jnp.dot(x_ref[...], w_ref[...],
                          preferred_element_type=jnp.float32)
                  + b_ref[...]).astype(o_ref.dtype)


def _kred_kernel_f32out(x_ref, w_ref, b_ref, o_ref):
    # f32 output: accumulate directly into the resident output tile (no scratch).
    k = pl.program_id(2)

    @pl.when(k == 0)
    def _():
        o_ref[...] = jnp.zeros_like(o_ref)

    o_ref[...] += jnp.dot(x_ref[...], w_ref[...],
                          preferred_element_type=jnp.float32)

    @pl.when(k == pl.num_programs(2) - 1)
    def _():
        o_ref[...] += b_ref[...]


def _kred_kernel_acc(x_ref, w_ref, b_ref, o_ref, acc_ref):
    # Narrow output dtype: f32 VMEM accumulator, cast in the epilogue.
    k = pl.program_id(2)

    @pl.when(k == 0)
    def _():
        acc_ref[...] = jnp.zeros_like(acc_ref)

    acc_ref[...] += jnp.dot(x_ref[...], w_ref[...],
                            preferred_element_type=jnp.float32)

    @pl.when(k == pl.num_programs(2) - 1)
    def _():
        o_ref[...] = (acc_ref[...] + b_ref[...]).astype(o_ref.dtype)


# ----------------------------- host-side API ---------------------------------


def prepare_params(weight, bias, *, mxu_dtype=jnp.bfloat16):
    """One-time parameter prep (call at init/load time, NOT per forward).

    weight: (num_outputs, num_inputs)  -- PyTorch nn.Linear layout.
    Returns (w_prepped (Kp, Np) mxu_dtype, b_prepped (1, Np) float32), with K/N
    zero-padded up to multiples of 128 and the weight pre-transposed so the
    kernel does a plain (tm,tk)@(tk,tn) contraction (no transpose anywhere).
    """
    N, K = weight.shape
    Kp, Np = _round_up(K, 128), _round_up(N, 128)
    w = jnp.pad(weight.astype(mxu_dtype).T, ((0, Kp - K), (0, Np - N)))
    b = jnp.pad(bias.astype(jnp.float32).reshape(1, N), ((0, 0), (0, Np - N)))
    return w, b


@functools.partial(
    jax.jit,
    static_argnames=("num_outputs", "mxu_dtype", "tiles", "allow_xla_fallback"))
def linear_classifier_forward(x, w_prepped, b_prepped, *, num_outputs,
                              mxu_dtype=jnp.bfloat16, tiles=None,
                              allow_xla_fallback=False):
    """logits = x @ weight.T + bias, using params from `prepare_params`.

    x:         (B, num_inputs)  (extra trailing dims are flattened).
    w_prepped: (Kp, Np) mxu_dtype, b_prepped: (1, Np) f32.
    `tiles` (tm, tn, tk) are treated as upper bounds and aligned/validated.
    """
    if x.ndim > 2:                       # Flatten-style (B, ...) -> (B, K)
        x = x.reshape(x.shape[0], -1)
    B, K = x.shape
    Kp, Np = w_prepped.shape
    assert Kp == _round_up(K, 128), (K, Kp)
    assert Np >= num_outputs
    out_dtype = x.dtype

    in_bytes = jnp.dtype(mxu_dtype).itemsize
    out_bytes = jnp.dtype(out_dtype).itemsize

    # Optional tiny-problem fast path (XLA fused dot beats kernel overhead).
    if allow_xla_fallback and 2 * B * K * num_outputs < (1 << 20):
        out = jnp.dot(x.astype(mxu_dtype), w_prepped[:K, :num_outputs],
                      preferred_element_type=jnp.float32)
        return (out + b_prepped[0, :num_outputs]).astype(out_dtype)

    cfg = _gen_config()
    if tiles is not None:
        max_tm, max_tn, max_tk = tiles
    else:
        max_tm, max_tn, max_tk = cfg["max_tm"], cfg["max_tn"], cfg["max_tk"]

    # bf16 packs 2 rows per sublane -> 16-row M alignment; f32 -> 8; int8 -> 32.
    m_align = max(8, 32 // in_bytes)
    Mp = _round_up(B, m_align)

    tm = _largest_aligned_divisor(Mp, m_align, max(m_align, max_tm))
    tn = _largest_aligned_divisor(Np, 128, max(128, max_tn))

    # v7x: guarantee >=2 parallel output blocks so both TensorCores are used.
    if cfg["two_core"] and (Mp // tm) * (Np // tn) < 2 and Mp >= 2 * m_align:
        tm = _largest_aligned_divisor(Mp, m_align, Mp // 2)

    budget = int(0.75 * cfg["vmem_cap"])   # leave Mosaic scratch headroom

    def _fits(tk, with_acc):
        b = (2 * (tm * tk + tk * tn) * in_bytes   # double-buffered X / W tiles
             + 2 * tm * tn * out_bytes            # double-buffered output tile
             + 2 * tn * 4)                        # bias tile
        if with_acc:
            b += tm * tn * 4
        return b <= budget

    # Prefer full-K: removes the k grid axis, the scratch, and W re-reads per k.
    use_fullk = Kp <= max(128, max_tk) and _fits(Kp, with_acc=False)
    if use_fullk:
        tk = Kp
    else:
        tk = 128
        need_acc = out_dtype != jnp.float32
        cap_k = max(128, min(max_tk, Kp))
        for d in range(cap_k - cap_k % 128, 127, -128):
            if Kp % d == 0 and _fits(d, with_acc=need_acc):
                tk = d
                break

    xp = x.astype(mxu_dtype)
    if (Mp, Kp) != (B, K):
        xp = jnp.pad(xp, ((0, Mp - B), (0, Kp - K)))

    cost = pl.CostEstimate(
        flops=2 * Mp * Np * Kp,
        bytes_accessed=int(Mp * Kp * in_bytes + Kp * Np * in_bytes
                           + Mp * Np * out_bytes + Np * 4),
        transcendentals=0)

    if use_fullk:
        out_padded = pl.pallas_call(
            _fullk_kernel,
            out_shape=jax.ShapeDtypeStruct((Mp, Np), out_dtype),
            grid_spec=pltpu.PrefetchScalarGridSpec(
                num_scalar_prefetch=0,
                grid=(Mp // tm, Np // tn),
                in_specs=[
                    pl.BlockSpec((tm, Kp), lambda i, j: (i, 0)),   # X
                    pl.BlockSpec((Kp, tn), lambda i, j: (0, j)),   # W (K, N)
                    pl.BlockSpec((1, tn), lambda i, j: (0, j)),    # bias
                ],
                out_specs=pl.BlockSpec((tm, tn), lambda i, j: (i, j)),
            ),
            compiler_params=pltpu.CompilerParams(
                dimension_semantics=("parallel", "parallel"),
                vmem_limit_bytes=int(cfg["vmem_cap"])),
            cost_estimate=cost,
        )(xp, w_prepped, b_prepped)
    else:
        grid = (Mp // tm, Np // tn, Kp // tk)
        in_specs = [
            pl.BlockSpec((tm, tk), lambda i, j, k: (i, k)),   # X
            pl.BlockSpec((tk, tn), lambda i, j, k: (k, j)),   # W (K, N)
            pl.BlockSpec((1, tn), lambda i, j, k: (0, j)),    # bias
        ]
        out_spec = pl.BlockSpec((tm, tn), lambda i, j, k: (i, j))
        cparams = pltpu.CompilerParams(
            dimension_semantics=("parallel", "parallel", "arbitrary"),
            vmem_limit_bytes=int(cfg["vmem_cap"]))
        if out_dtype == jnp.float32:
            out_padded = pl.pallas_call(
                _kred_kernel_f32out,
                out_shape=jax.ShapeDtypeStruct((Mp, Np), out_dtype),
                grid_spec=pltpu.PrefetchScalarGridSpec(
                    num_scalar_prefetch=0, grid=grid,
                    in_specs=in_specs, out_specs=out_spec),
                compiler_params=cparams,
                cost_estimate=cost,
            )(xp, w_prepped, b_prepped)
        else:
            out_padded = pl.pallas_call(
                _kred_kernel_acc,
                out_shape=jax.ShapeDtypeStruct((Mp, Np), out_dtype),
                grid_spec=pltpu.PrefetchScalarGridSpec(
                    num_scalar_prefetch=0, grid=grid,
                    in_specs=in_specs, out_specs=out_spec,
                    scratch_shapes=[pltpu.VMEM((tm, tn), jnp.float32)]),
                compiler_params=cparams,
                cost_estimate=cost,
            )(xp, w_prepped, b_prepped)

    return out_padded[:B, :num_outputs]


def init_params(key, num_inputs, num_outputs):
    """Mirror the PyTorch module: xavier_uniform weight, default Linear bias."""
    kw, kb = jax.random.split(key)
    limit_w = jnp.sqrt(6.0 / (num_inputs + num_outputs))
    weight = jax.random.uniform(
        kw, (num_outputs, num_inputs), jnp.float32, -limit_w, limit_w)
    limit_b = 1.0 / jnp.sqrt(num_inputs)
    bias = jax.random.uniform(
        kb, (num_outputs,), jnp.float32, -limit_b, limit_b)
    return weight, bias


if __name__ == "__main__":
    key = jax.random.PRNGKey(0)
    kx, kp, kx2, kp2 = jax.random.split(key, 4)

    # --- Test 1: module-spec shapes, bf16 MXU default, full-K single block ---
    batch, num_inputs, num_outputs = 8, 32, 16
    x = jax.random.normal(kx, (batch, num_inputs), jnp.float32)
    weight, bias = init_params(kp, num_inputs, num_outputs)
    wp, bp = prepare_params(weight, bias)                    # one-time prep

    logits = linear_classifier_forward(x, wp, bp, num_outputs=num_outputs)
    jax.block_until_ready(logits)
    assert logits.shape == (batch, num_outputs)
    ref_bf16 = (x.astype(jnp.bfloat16).astype(jnp.float32)
                @ weight.astype(jnp.bfloat16).astype(jnp.float32).T + bias)
    assert jnp.allclose(logits, ref_bf16, atol=2e-2, rtol=2e-2), "bf16 small"

    # --- Test 2: explicit f32 MXU path (exact) --------------------------------
    wp32, bp32 = prepare_params(weight, bias, mxu_dtype=jnp.float32)
    logits32 = linear_classifier_forward(
        x, wp32, bp32, num_outputs=num_outputs, mxu_dtype=jnp.float32)
    jax.block_until_ready(logits32)
    ref32 = x @ weight.T + bias
    assert jnp.allclose(logits32, ref32, atol=1e-5, rtol=1e-5), "f32 small"

    # --- Test 3: forced K-reduction grid, f32-out accumulate-into-output -----
    B2, K2, N2 = 192, 640, 256
    x2 = jax.random.normal(kx2, (B2, K2), jnp.float32)
    w2, b2 = init_params(kp2, K2, N2)
    wp2, bp2 = prepare_params(w2, b2)                        # bf16
    small_tiles = (64, 128, 128)                             # caps -> grid (3,2,5)
    logits2 = linear_classifier_forward(
        x2, wp2, bp2, num_outputs=N2, tiles=small_tiles)
    jax.block_until_ready(logits2)
    ref2 = (x2.astype(jnp.bfloat16).astype(jnp.float32)
            @ w2.astype(jnp.bfloat16).astype(jnp.float32).T + b2)
    assert jnp.allclose(logits2, ref2, atol=5e-2, rtol=3e-2), "bf16 tiled"

    # --- Test 4: bf16 activations/output -> scratch-accumulator kernel -------
    logits3 = linear_classifier_forward(
        x2.astype(jnp.bfloat16), wp2, bp2, num_outputs=N2, tiles=small_tiles)
    jax.block_until_ready(logits3)
    assert logits3.dtype == jnp.bfloat16
    assert jnp.allclose(logits3.astype(jnp.float32), ref2,
                        atol=5e-2, rtol=2e-2), "bf16-out tiled"

    print("KERNEL_OK")
</pallas_src>

<mosaic_0001>
module attributes {stable_mosaic.version = 11 : i64} {
  func.func @_fullk_kernel(%arg0: i32, %arg1: i32, %arg2: memref<16x128xbf16, #tpu.memory_space<vmem>>, %arg3: memref<128x128xbf16, #tpu.memory_space<vmem>>, %arg4: memref<1x128xf32, #tpu.memory_space<vmem>>, %arg5: memref<16x128xf32, #tpu.memory_space<vmem>>) attributes {dimension_semantics = [#tpu.dimension_semantics<parallel>, #tpu.dimension_semantics<parallel>], iteration_bounds = array<i64: 1, 1>, scalar_prefetch = 0 : i64, scratch_operands = 0 : i64, tpu.core_type = #tpu.core_type<tc>, window_params = [{transform_indices = @transform_0, window_bounds = array<i64: 16, 128>}, {transform_indices = @transform_1, window_bounds = array<i64: 128, 128>}, {transform_indices = @transform_2, window_bounds = array<i64: 1, 128>}, {transform_indices = @transform_3, window_bounds = array<i64: 16, 128>}]} {
    %c0 = arith.constant 0 : index
    %c0_0 = arith.constant 0 : index
    %0 = vector.load %arg2[%c0, %c0_0] : memref<16x128xbf16, #tpu.memory_space<vmem>>, vector<16x128xbf16>
    %c0_1 = arith.constant 0 : index
    %c0_2 = arith.constant 0 : index
    %1 = vector.load %arg3[%c0_1, %c0_2] : memref<128x128xbf16, #tpu.memory_space<vmem>>, vector<128x128xbf16>
    %cst = arith.constant dense<0.000000e+00> : vector<16x128xf32>
    %2 = tpu.matmul %0, %1, %cst {dimension_numbers = #tpu.dot_dimension_numbers<[1], [0], [0], [1], [0, 0, 1, 1], [], []>} : vector<16x128xbf16>, vector<128x128xbf16>, vector<16x128xf32> -> vector<16x128xf32>
    %c0_3 = arith.constant 0 : index
    %c0_4 = arith.constant 0 : index
    %3 = vector.load %arg4[%c0_3, %c0_4] : memref<1x128xf32, #tpu.memory_space<vmem>>, vector<1x128xf32>
    %4 = vector.broadcast %3 : vector<1x128xf32> to vector<16x128xf32>
    %5 = arith.addf %2, %4 : vector<16x128xf32>
    %c0_5 = arith.constant 0 : index
    %c0_6 = arith.constant 0 : index
    %6 = vector.load %arg5[%c0_5, %c0_6] : memref<16x128xf32, #tpu.memory_space<vmem>>, vector<16x128xf32>
    tpu.vector_store %arg5[%c0_5, %c0_6], %5 {strides = array<i32>} : memref<16x128xf32, #tpu.memory_space<vmem>>, vector<16x128xf32>,
    return
  }
  func.func @transform_0(%arg0: i32, %arg1: i32) -> (i32, i32) {
    %c0_i32 = arith.constant 0 : i32
    %c0_i32_0 = arith.constant 0 : i32
    return %arg0, %c0_i32 : i32, i32
  }
  func.func @transform_1(%arg0: i32, %arg1: i32) -> (i32, i32) {
    %c0_i32 = arith.constant 0 : i32
    %c0_i32_0 = arith.constant 0 : i32
    return %c0_i32, %arg1 : i32, i32
  }
  func.func @transform_2(%arg0: i32, %arg1: i32) -> (i32, i32) {
    %c0_i32 = arith.constant 0 : i32
    %c0_i32_0 = arith.constant 0 : i32
    return %c0_i32, %arg1 : i32, i32
  }
  func.func @transform_3(%arg0: i32, %arg1: i32) -> (i32, i32) {
    %c0_i32 = arith.constant 0 : i32
    return %arg0, %arg1 : i32, i32
  }
}

</mosaic_0001>

<bundles_post_ra>
// kernel: linear_classifier_forward.1
= control target key start
LH: loop header
LB: loop body
LE: loop exit
PB: predicated region body
PF: predicated region fallthrough
CT: control target
= control target key end

     0   :  { %8 = vsyncpa [#allocation3], 0  ;;  %s202_s15 = smov [#allocation2]   ;;  %s203_s17 = smov 64   ;;  %s240_s0 = inlined_call_operand.vmem [shape: bf16[16,128], index: 0, kind: input, shape index: {}]   ;;  %s241_s1 = inlined_call_operand.hbm [shape: bf16[128,128], index: 1, kind: input, shape index: {}]   ;;  %s242_s2 = inlined_call_operand.vmem [shape: f32[1,128], index: 2, kind: input, shape index: {}]   ;;  %s243_s3 = inlined_call_operand.vmem [shape: f32[16,128], index: 3, kind: output, shape index: {}]  }
   0x1   :  { %s15_s14 = sshll.u32 %s241_s1, 4  ;;  %s17_s16 = sshll.u32 %s202_s15, 4  ;;  %s16_s14 = int_to_ptr.hbm [resolvable:$true] %s15_s14  ;;  %s18_s16 = int_to_ptr.vmem [resolvable:$true] %s17_s16 }
   0x2   :  { %s204_s18 = smov 4  }
   0x3   :  { %23 = dma.hbm_to_vmem [thread:$0]  %s16_s14, 1024, %s18_s16, [#allocation3], %s203_s17, %s203_s17, %s204_s18  }
   0x4   :  { %200 = dma.done.wait [#allocation3], 1024  }
   0x5   :  { %201 = vsyncadd [#allocation3], 4294966272  ;;  %v171_v0 = vld [vmem:[#allocation2 + $0x38] sm:$0xff]  ;;  %v170_v1 = vld [vmem:[#allocation2 + $0x30] sm:$0xff] }
   0x6   :  { %106 = vmatpush.bf16.msra.mxu0 %v171_v0  ;;  %v169_v2 = vld [vmem:[#allocation2 + $0x28] sm:$0xff]  ;;  %v168_v3 = vld [vmem:[#allocation2 + $0x20] sm:$0xff]  ;;  %v167_v4 = vld [vmem:[#allocation2 + $0x18] sm:$0xff] }
   0x7   :  { %v166_v5 = vld [vmem:[#allocation2 + $0x10] sm:$0xff]  ;;  %v165_v6 = vld [vmem:[#allocation2 + $0x8] sm:$0xff]  ;;  %v164_v7 = vld [vmem:[#allocation2] sm:$0xff] }
   0x8   :  { %v163_v8 = vld [vmem:[%s240_s0] sm:$0xff] }
   0x9   :  { %v175_v9 = vld [vmem:[%s242_s2] ss:$0 sm:$0xff] }
   0xa   :  { %107 = vmatpush.bf16.msra.mxu0 %v170_v1 }
   0xe   :  { %108 = vmatpush.bf16.msra.mxu0 %v169_v2 }
  0x12   :  { %109 = vmatpush.bf16.msra.mxu0 %v168_v3 }
  0x16   :  { %110 = vmatpush.bf16.msra.mxu0 %v167_v4 }
  0x1a   :  { %111 = vmatpush.bf16.msra.mxu0 %v166_v5 }
  0x1e   :  { %112 = vmatpush.bf16.msra.mxu0 %v165_v6 }
  0x22   :  { %113 = vmatpush.bf16.msra.mxu0 %v164_v7 }
  0x25   :  { %114 = vmatmul.bf16.vlgmr.msra.gmra.mxu0 %v163_v8 }
  0xa2   :  { %v115_v10 = vpop.f32.mrf.mxu0 }
  0xa3   :  { %v116_v11 = vadd.f32 %v175_v9, %v115_v10 }
  0xa5   :  { %120 = vst [vmem:[%s243_s3] sm:$0xff] %v116_v11 }
  0xaa   :  { %v117_v12 = vpop.f32.mrf.mxu0 }
  0xab   :  { %v118_v13 = vadd.f32 %v175_v9, %v117_v12 }
  0xad   :  { %121 = vst [vmem:[%s243_s3 + $0x8] sm:$0xff] %v118_v13 }
  0xae   :  { %126 = vsyncpa [#allocation3], 1 }

</bundles_post_ra>
